<compile_context>
chip_gen: v7x
topology: tpu7x:2x2x1
jax: 0.10.0
libtpu: 0.0.40
codegen_flags: <defaults>
</compile_context>

<pallas_src>
import jax
import jax.numpy as jnp
import numpy as np
from jax.experimental import pallas as pl
from jax.experimental.pallas import tpu as pltpu


# --------------------------------------------------------------------------
# Kernel
# --------------------------------------------------------------------------
def _make_kernel(ns_total, tile_bv, hw, num_joints):
    # For larger joint counts a single log pass over the tile (EUP slot) plus
    # one lane reduce beats J select+reduce passes (VALU slot) — review item
    # for v7x where the VALU binds.  For small J the per-joint gather is lighter.
    use_count_path = num_joints >= 8

    def kernel(idx_ref, hm_ref, out_ref):
        # idx_ref: [T, JPAD] int32, precomputed clamped flat indices (lane padded)
        # hm_ref : [T, HW]   heatmap values in their HBM dtype (no full-tile cast)
        # out_ref: [1, 8, 128] per-tile partial sum (broadcast scalar)
        hm = hm_ref[...]                                          # [T, HW] input dtype
        idx = idx_ref[...]                                        # [T, JPAD] int32

        lane_iota = jax.lax.broadcasted_iota(jnp.int32, (tile_bv, hw), 1)

        if use_count_path:
            # match count per lane (float in hm dtype: exact for small counts)
            count = jnp.zeros((tile_bv, hw), hm.dtype)
            for j in range(num_joints):                           # static unroll, J small
                count = count + (lane_iota == idx[:, j:j + 1]).astype(hm.dtype)
            lg = jnp.log(hm)                                      # one EUP pass, input dtype
            contrib = jnp.where(count > 0, count * lg, 0.0)       # select avoids 0*log(0)=NaN
            per_sample = -jnp.sum(contrib, axis=-1,
                                  keepdims=True).astype(jnp.float32)   # [T, 1]
        else:
            per_sample = jnp.zeros((tile_bv, 1), jnp.float32)
            for j in range(num_joints):                           # static unroll, J small
                mask = lane_iota == idx[:, j:j + 1]               # [T, HW]
                # exactly one nonzero per row -> sum in input dtype is exact
                val = jnp.sum(jnp.where(mask, hm, 0.0), axis=-1,
                              keepdims=True).astype(jnp.float32)  # [T, 1]
                per_sample = per_sample - jnp.log(val)

        # Mask samples past the real batch end (tail-block padding) ONCE,
        # after the loop.  jnp.where is a select, so NaN/inf from garbage
        # padding rows cannot propagate.
        sample_id = (pl.program_id(0) * tile_bv
                     + jax.lax.broadcasted_iota(jnp.int32, (tile_bv, 1), 0))
        per_sample = jnp.where(sample_id < ns_total, per_sample, 0.0)

        total = jnp.sum(per_sample)                               # scalar
        out_ref[...] = jnp.full(out_ref.shape, total, dtype=jnp.float32)

    return kernel


# --------------------------------------------------------------------------
# Tiling / device helpers
# --------------------------------------------------------------------------
def _choose_tile_bv(ns, hw, sublane):
    """Samples per grid step.

    Element-count budget of ~2M elements (~8 MiB of f32) per heatmap block:
    double-buffered plus elementwise intermediates this stays well inside
    v7x's 64 MiB/TC VMEM (and trivially inside v5e/v6e's 128 MiB), while the
    ~0.35 us/step grid overhead amortizes to a few percent of the block DMA.
    """
    max_elems = (8 << 20) // 4
    if ns * hw <= max_elems:
        return ns                         # whole batch in one full-extent block
    t = max(1, max_elems // hw)
    t = min(t, 4096)                      # bound idx block / iota intermediates
    t = min(t, -(-ns // 4))               # keep >= 4 grid steps so DMA overlaps compute
    t = (t // sublane) * sublane          # sublane alignment ((8,128) rule)
    t = max(t, sublane)                   # kernel masks any tail overrun
    return min(t, ns)


def _is_tpu_v7():
    try:
        kind = jax.devices()[0].device_kind.lower()
    except Exception:
        return False
    return "v7" in kind


# --------------------------------------------------------------------------
# Wrapper
# --------------------------------------------------------------------------
def heatmap_ce_loss(keypoints_gt, heatmap, *, compute_in_bf16=False,
                    _force_tile_bv=None):
    """keypoints_gt: [B, V, J, 2] float (x, y); heatmap: [B, V, 1, H, W] float (>0).

    compute_in_bf16: opt-in — store the heatmap in bf16 in HBM (halves the
    dominant HBM read); changes -log(p) by ~1e-3 relative, so off by default.
    _force_tile_bv: test-only override (must be a sublane multiple or == B*V).
    """
    B, V, J, _ = keypoints_gt.shape
    _, _, _, H, W = heatmap.shape
    assert H == W, (
        "HeatmapCELoss clamps both coordinates with heatmap.shape[3]; only "
        f"square heatmaps are supported (got H={H}, W={W}).")
    NS = B * V
    HW = H * W
    side = H

    # --- precompute clamped flat gather indices in the wrapper (XLA) ---
    kp = keypoints_gt.reshape(NS, J, 2)
    kpc = jnp.ceil(kp).astype(jnp.int32)                          # trunc==ceil (integral)
    x_idx = jnp.clip(kpc[..., 0], 0, side - 1)                    # [NS, J]
    y_idx = jnp.clip(kpc[..., 1], 0, side - 1)                    # [NS, J]
    flat_idx = (y_idx * W + x_idx).astype(jnp.int32)              # [NS, J]

    # lane-pad the index block to a full 128 lanes (full-lane idx DMA rows)
    JPAD = 128 * pl.cdiv(J, 128)
    flat_idx = jnp.pad(flat_idx, ((0, 0), (0, JPAD - J)))

    # --- lane-dense heatmap: [NS, H*W]; dtype cast only if opted in ---
    hm_flat = heatmap[:, :, 0, :, :].reshape(NS, HW)
    if compute_in_bf16:
        hm_flat = hm_flat.astype(jnp.bfloat16)

    itemsize = jnp.dtype(hm_flat.dtype).itemsize
    sublane = 8 if itemsize >= 4 else (16 if itemsize == 2 else 32)
    if _force_tile_bv is not None:
        TILE_BV = int(_force_tile_bv)
    else:
        TILE_BV = _choose_tile_bv(NS, HW, sublane)
    num_tiles = pl.cdiv(NS, TILE_BV)

    kernel = _make_kernel(NS, TILE_BV, HW, J)

    # Grid semantics: per-tile partials are independent, so on a 2-TC part
    # (v7x) actually shard the tile loop across cores; on single-TC v5e/v6e
    # keep the known-good PARALLEL annotation (codegen-neutral there).
    dim_sem = (pltpu.PARALLEL,)
    if _is_tpu_v7() and num_tiles >= 2 and num_tiles % 2 == 0:
        dim_sem = (pltpu.CORE_PARALLEL,)

    partials = pl.pallas_call(
        kernel,
        out_shape=jax.ShapeDtypeStruct((num_tiles, 8, 128), jnp.float32),
        grid_spec=pltpu.PrefetchScalarGridSpec(
            num_scalar_prefetch=0,
            grid=(num_tiles,),
            in_specs=[
                pl.BlockSpec((TILE_BV, JPAD), lambda i: (i, 0)),
                pl.BlockSpec((TILE_BV, HW), lambda i: (i, 0)),
            ],
            out_specs=pl.BlockSpec((1, 8, 128), lambda i: (i, 0, 0)),
        ),
        compiler_params=pltpu.CompilerParams(
            dimension_semantics=dim_sem,
            # 2 x 8 MiB hm buffers + idx buffers + elementwise intermediates,
            # with headroom under v7x's 64 MiB physical VMEM per TensorCore.
            vmem_limit_bytes=48 << 20),
    )(flat_idx, hm_flat)

    total = jnp.sum(partials[:, 0, 0])
    n_losses = B * V * J
    return total / jnp.float32(n_losses)


# --------------------------------------------------------------------------
# Self-test
# --------------------------------------------------------------------------
def _ref_loss(kp_np, hm_np):
    """Pure-numpy reference mirroring the PyTorch loop exactly."""
    B, V, J, _ = kp_np.shape
    side = hm_np.shape[3]
    loss, n = 0.0, 0
    for b in range(B):
        for v in range(V):
            kpc = np.ceil(kp_np[b, v])
            for j in range(J):
                y = min(max(int(kpc[j, 1]), 0), side - 1)
                x = min(max(int(kpc[j, 0]), 0), side - 1)
                loss += -np.log(hm_np[b, v, 0, y, x])
                n += 1
    return loss / n


if __name__ == "__main__":
    key = jax.random.PRNGKey(0)

    configs = [
        # (B, V, J, H, forced tile) — covers per-joint path, count*log path,
        # and the multi-tile grid with a masked tail block.
        dict(B=2, V=3, J=5, H=16, force_tile=None),
        dict(B=2, V=3, J=9, H=16, force_tile=None),
        dict(B=4, V=5, J=7, H=12, force_tile=8),
    ]

    for cfg in configs:
        key, k1, k2 = jax.random.split(key, 3)
        B, V, J, H = cfg["B"], cfg["V"], cfg["J"], cfg["H"]
        # keypoints range past [0, H) so the clamping path is exercised
        keypoints_gt = jax.random.uniform(
            k1, (B, V, J, 2), jnp.float32, minval=-2.0, maxval=float(H) + 2.0)
        # strictly positive heatmap so log() is finite
        heatmap = jax.random.uniform(
            k2, (B, V, 1, H, H), jnp.float32, minval=0.05, maxval=1.0)

        out = jax.block_until_ready(
            heatmap_ce_loss(keypoints_gt, heatmap,
                            _force_tile_bv=cfg["force_tile"]))
        ref = _ref_loss(np.asarray(keypoints_gt), np.asarray(heatmap))
        assert np.allclose(float(out), ref, rtol=1e-5, atol=1e-5), \
            (cfg, float(out), ref)

    print("KERNEL_OK")
</pallas_src>

<mosaic_0001>
module attributes {stable_mosaic.version = 11 : i64} {
  func.func @kernel(%arg0: i32, %arg1: memref<6x128xi32, #tpu.memory_space<vmem>>, %arg2: memref<6x256xf32, #tpu.memory_space<vmem>>, %arg3: memref<1x8x128xf32, #tpu.memory_space<vmem>>) attributes {dimension_semantics = [#tpu.dimension_semantics<parallel>], iteration_bounds = array<i64: 1>, scalar_prefetch = 0 : i64, scratch_operands = 0 : i64, tpu.core_type = #tpu.core_type<tc>, window_params = [{transform_indices = @transform_0, window_bounds = array<i64: 6, 128>}, {transform_indices = @transform_1, window_bounds = array<i64: 6, 256>}, {transform_indices = @transform_2, window_bounds = array<i64: 1, 8, 128>}]} {
    %c0 = arith.constant 0 : index
    %c0_0 = arith.constant 0 : index
    %0 = vector.load %arg2[%c0, %c0_0] : memref<6x256xf32, #tpu.memory_space<vmem>>, vector<6x256xf32>
    %c0_1 = arith.constant 0 : index
    %c0_2 = arith.constant 0 : index
    %1 = vector.load %arg1[%c0_1, %c0_2] : memref<6x128xi32, #tpu.memory_space<vmem>>, vector<6x128xi32>
    %2 = tpu.iota {dimensions = array<i32: 1>} : vector<6x256xi32>
    %cst = arith.constant 0.000000e+00 : f32
    %3 = vector.broadcast %cst : f32 to vector<6x1xf32>
    %4 = vector.extract_strided_slice %1 {offsets = [0, 0], sizes = [6, 1], strides = [1, 1]} : vector<6x128xi32> to vector<6x1xi32>
    %5 = vector.broadcast %4 : vector<6x1xi32> to vector<6x256xi32>
    %6 = arith.cmpi eq, %2, %5 : vector<6x256xi32>
    %cst_3 = arith.constant 0.000000e+00 : f32
    %7 = vector.broadcast %cst_3 : f32 to vector<6x256xf32>
    %8 = arith.select %6, %0, %7 : vector<6x256xi1>, vector<6x256xf32>
    %cst_4 = arith.constant dense<0.000000e+00> : vector<6xf32>
    %9 = vector.multi_reduction <add>, %8, %cst_4 [1] : vector<6x256xf32> to vector<6xf32>
    %10 = vector.shape_cast %9 : vector<6xf32> to vector<6x1xf32>
    %11 = math.log %10 : vector<6x1xf32>
    %12 = arith.subf %3, %11 : vector<6x1xf32>
    %13 = vector.extract_strided_slice %1 {offsets = [0, 1], sizes = [6, 1], strides = [1, 1]} : vector<6x128xi32> to vector<6x1xi32>
    %14 = vector.broadcast %13 : vector<6x1xi32> to vector<6x256xi32>
    %15 = arith.cmpi eq, %2, %14 : vector<6x256xi32>
    %cst_5 = arith.constant 0.000000e+00 : f32
    %16 = vector.broadcast %cst_5 : f32 to vector<6x256xf32>
    %17 = arith.select %15, %0, %16 : vector<6x256xi1>, vector<6x256xf32>
    %cst_6 = arith.constant dense<0.000000e+00> : vector<6xf32>
    %18 = vector.multi_reduction <add>, %17, %cst_6 [1] : vector<6x256xf32> to vector<6xf32>
    %19 = vector.shape_cast %18 : vector<6xf32> to vector<6x1xf32>
    %20 = math.log %19 : vector<6x1xf32>
    %21 = arith.subf %12, %20 : vector<6x1xf32>
    %22 = vector.extract_strided_slice %1 {offsets = [0, 2], sizes = [6, 1], strides = [1, 1]} : vector<6x128xi32> to vector<6x1xi32>
    %23 = vector.broadcast %22 : vector<6x1xi32> to vector<6x256xi32>
    %24 = arith.cmpi eq, %2, %23 : vector<6x256xi32>
    %cst_7 = arith.constant 0.000000e+00 : f32
    %25 = vector.broadcast %cst_7 : f32 to vector<6x256xf32>
    %26 = arith.select %24, %0, %25 : vector<6x256xi1>, vector<6x256xf32>
    %cst_8 = arith.constant dense<0.000000e+00> : vector<6xf32>
    %27 = vector.multi_reduction <add>, %26, %cst_8 [1] : vector<6x256xf32> to vector<6xf32>
    %28 = vector.shape_cast %27 : vector<6xf32> to vector<6x1xf32>
    %29 = math.log %28 : vector<6x1xf32>
    %30 = arith.subf %21, %29 : vector<6x1xf32>
    %31 = vector.extract_strided_slice %1 {offsets = [0, 3], sizes = [6, 1], strides = [1, 1]} : vector<6x128xi32> to vector<6x1xi32>
    %32 = vector.broadcast %31 : vector<6x1xi32> to vector<6x256xi32>
    %33 = arith.cmpi eq, %2, %32 : vector<6x256xi32>
    %cst_9 = arith.constant 0.000000e+00 : f32
    %34 = vector.broadcast %cst_9 : f32 to vector<6x256xf32>
    %35 = arith.select %33, %0, %34 : vector<6x256xi1>, vector<6x256xf32>
    %cst_10 = arith.constant dense<0.000000e+00> : vector<6xf32>
    %36 = vector.multi_reduction <add>, %35, %cst_10 [1] : vector<6x256xf32> to vector<6xf32>
    %37 = vector.shape_cast %36 : vector<6xf32> to vector<6x1xf32>
    %38 = math.log %37 : vector<6x1xf32>
    %39 = arith.subf %30, %38 : vector<6x1xf32>
    %40 = vector.extract_strided_slice %1 {offsets = [0, 4], sizes = [6, 1], strides = [1, 1]} : vector<6x128xi32> to vector<6x1xi32>
    %41 = vector.broadcast %40 : vector<6x1xi32> to vector<6x256xi32>
    %42 = arith.cmpi eq, %2, %41 : vector<6x256xi32>
    %cst_11 = arith.constant 0.000000e+00 : f32
    %43 = vector.broadcast %cst_11 : f32 to vector<6x256xf32>
    %44 = arith.select %42, %0, %43 : vector<6x256xi1>, vector<6x256xf32>
    %cst_12 = arith.constant dense<0.000000e+00> : vector<6xf32>
    %45 = vector.multi_reduction <add>, %44, %cst_12 [1] : vector<6x256xf32> to vector<6xf32>
    %46 = vector.shape_cast %45 : vector<6xf32> to vector<6x1xf32>
    %47 = math.log %46 : vector<6x1xf32>
    %48 = arith.subf %39, %47 : vector<6x1xf32>
    %c6_i32 = arith.constant 6 : i32
    %49 = arith.muli %arg0, %c6_i32 : i32
    %50 = tpu.iota {dimensions = array<i32: 0>} : vector<6x1xi32>
    %51 = vector.broadcast %49 : i32 to vector<6x1xi32>
    %52 = arith.addi %51, %50 : vector<6x1xi32>
    %c6_i32_13 = arith.constant 6 : i32
    %53 = vector.broadcast %c6_i32_13 : i32 to vector<6x1xi32>
    %54 = arith.cmpi slt, %52, %53 : vector<6x1xi32>
    %cst_14 = arith.constant 0.000000e+00 : f32
    %55 = vector.broadcast %cst_14 : f32 to vector<6x1xf32>
    %56 = arith.select %54, %48, %55 : vector<6x1xi1>, vector<6x1xf32>
    %57 = vector.shape_cast %56 : vector<6x1xf32> to vector<1x6x1xf32>
    %cst_15 = arith.constant dense<0.000000e+00> : vector<1xf32>
    %58 = vector.multi_reduction <add>, %57, %cst_15 [1, 2] : vector<1x6x1xf32> to vector<1xf32>
    %59 = vector.shape_cast %58 : vector<1xf32> to vector<1x1x1xf32>
    %60 = vector.extract %59[0, 0, 0] : f32 from vector<1x1x1xf32>
    %61 = vector.broadcast %60 : f32 to vector<1x8x128xf32>
    %c0_16 = arith.constant 0 : index
    %c0_17 = arith.constant 0 : index
    %c0_18 = arith.constant 0 : index
    %62 = vector.load %arg3[%c0_16, %c0_17, %c0_18] : memref<1x8x128xf32, #tpu.memory_space<vmem>>, vector<1x8x128xf32>
    tpu.vector_store %arg3[%c0_16, %c0_17, %c0_18], %61 {strides = array<i32>} : memref<1x8x128xf32, #tpu.memory_space<vmem>>, vector<1x8x128xf32>,
    return
  }
  func.func @transform_0(%arg0: i32) -> (i32, i32) {
    %c0_i32 = arith.constant 0 : i32
    %c0_i32_0 = arith.constant 0 : i32
    return %arg0, %c0_i32 : i32, i32
  }
  func.func @transform_1(%arg0: i32) -> (i32, i32) {
    %c0_i32 = arith.constant 0 : i32
    %c0_i32_0 = arith.constant 0 : i32
    return %arg0, %c0_i32 : i32, i32
  }
  func.func @transform_2(%arg0: i32) -> (i32, i32, i32) {
    %c0_i32 = arith.constant 0 : i32
    %c0_i32_0 = arith.constant 0 : i32
    %c0_i32_1 = arith.constant 0 : i32
    return %arg0, %c0_i32, %c0_i32_0 : i32, i32, i32
  }
}

</mosaic_0001>

<bundles_post_ra>
// kernel: tpu_custom_call.1
= control target key start
LH: loop header
LB: loop body
LE: loop exit
PB: predicated region body
PF: predicated region fallthrough
CT: control target
= control target key end

     0   :  { %7 = vsyncpa [#allocation3], 0  ;;  %s323_s0 = inlined_call_operand.hbm [shape: s32[6,128], index: 0, kind: input, shape index: {}]   ;;  %s324_s1 = inlined_call_operand.hbm [shape: f32[6,256], index: 1, kind: input, shape index: {}]   ;;  %s325_s2 = inlined_call_operand.hbm [shape: f32[1,8,128], index: 2, kind: output, shape index: {}]  }
   0x1   :  { %8 = vsyncpa [#allocation6], 0 }
   0x2   :  { %9 = vsyncpa [#allocation4], 0  ;;  %s252_s9 = smov [#allocation2]   ;;  %s253_s11 = smov [#allocation5]  }
   0x3   :  { %s16_s10 = sshll.u32 %s252_s9, 4  ;;  %s26_s12 = sshll.u32 %s253_s11, 4  ;;  %s17_s10 = int_to_ptr.vmem [resolvable:$true] %s16_s10  ;;  %s27_s12 = int_to_ptr.vmem [resolvable:$true] %s26_s12 }
   0x4   :  { %s180_s15 = scalar_lea.hbm %s323_s0, 128 }
   0x5   :  { %p181_p0 = scmp.ne.s32.totalorder %s323_s0, %s180_s15  ;;  %p184_p1 = scmp.lt.u32.totalorder %s180_s15, %s323_s0 }
   0x7   :  { %p186_p2 = pnand %p184_p1, %p181_p0 }
   0x9   :  { %189 = shalt.err (!%p186_p2)
}
   0xa   :  { %s190_s20 = scalar_lea.vmem %s17_s10, 128  ;;  %p195_p4 = scmp.lt.s32.totalorder %s17_s10, %s17_s10 }
   0xb   :  { %p191_p3 = scmp.ne.s32.totalorder %s17_s10, %s190_s20  ;;  %p196_p5 = scmp.lt.s32.totalorder %s190_s20, %s190_s20 }
   0xd   :  { %p197_p6 = por %p196_p5, %p195_p4 }
   0xf   :  { %p198_p7 = pnand %p197_p6, %p191_p3 }
  0x11   :  { %201 = shalt.err (!%p198_p7)
}
  0x12   :  { %19 = dma.hbm_to_vmem [thread:$0]  %s323_s0, 128, %s17_s10, [#allocation3]  }
  0x13   :  { %s202_s25 = scalar_lea.hbm %s324_s1, 256 }
  0x14   :  { %p203_p8 = scmp.ne.s32.totalorder %s324_s1, %s202_s25  ;;  %p206_p9 = scmp.lt.u32.totalorder %s202_s25, %s324_s1 }
  0x16   :  { %p208_p10 = pnand %p206_p9, %p203_p8 }
  0x18   :  { %211 = shalt.err (!%p208_p10)
}
  0x19   :  { %s212_s30 = scalar_lea.vmem %s27_s12, 256  ;;  %p217_p12 = scmp.lt.s32.totalorder %s27_s12, %s27_s12 }
  0x1a   :  { %p213_p11 = scmp.ne.s32.totalorder %s27_s12, %s212_s30  ;;  %p218_p13 = scmp.lt.s32.totalorder %s212_s30, %s212_s30 }
  0x1c   :  { %p219_p0 = por %p218_p13, %p217_p12 }
  0x1e   :  { %p220_p1 = pnand %p219_p0, %p213_p11 }
  0x20   :  { %223 = shalt.err (!%p220_p1)
}
  0x21   :  { %29 = dma.hbm_to_vmem [thread:$0]  %s324_s1, 256, %s27_s12, [#allocation6]  }
  0x22   :  { %246 = dma.done.wait [#allocation3], 128  }
  0x23   :  { %247 = vsyncadd [#allocation3], 4294967168 }
  0x24   :  { %248 = dma.done.wait [#allocation6], 256  }
  0x25   :  { %249 = vsyncadd [#allocation6], 4294967040  ;;  %v254_v0 = vmov 0   ;;  %v255_v1 = vmov 2   ;;  %v38_v2 = vld [vmem:[#allocation2] sm:$0x3f]  ;;  %v39_v6 = vlaneseq }
  0x26   :  { %164 = vset.pattern.permute.xlu0 %v254_v0  ;;  %166 = vset.pattern.permute.xlu1 %v255_v1  ;;  %v256_v3 = vmov 1   ;;  %v257_v4 = vmov 3   ;;  %v258_v5 = vmov 4   ;;  %v36_v9 = vld [vmem:[#allocation5] sm:$0x3f]  ;;  %vm49_vm0 = vcmask 1045504  }
  0x27   :  { %43 = vperm.xlu0 %164, %v38_v2   ;;  %74 = vperm.xlu1 %166, %v38_v2   ;;  %v40_v7 = vand.u32 127, %v39_v6  ;;  %v37_v10 = vld [vmem:[#allocation5 + $0x8] sm:$0x3f]  ;;  %v120_v56 = vshrl.u32 %v39_v6, 7  ;;  %vm125_vm12 = vcmask 5120   ;;  %s259_s1 = smov [#allocation7]  }
  0x28   :  { %s144_s4 = sshll.u32 %s259_s1, 4  ;;  %s145_s4 = int_to_ptr.vmem [resolvable:$true] %s144_s4 }
  0x29   :  { %v41_v8 = vadd.s32 128, %v40_v7  ;;  %vm123_vm11 = vcmp.lt.s32.totalorder %v120_v56, 6  ;;  %s224_s6 = scalar_lea.vmem %s145_s4, 128  ;;  %p229_p3 = scmp.lt.s32.totalorder %s145_s4, %s145_s4 }
  0x2a   :  { %p225_p2 = scmp.ne.s32.totalorder %s145_s4, %s224_s6  ;;  %p230_p4 = scmp.lt.s32.totalorder %s224_s6, %s224_s6 }
  0x2b   :  { %165 = vset.pattern.permute.xlu0 %v256_v3  ;;  %167 = vset.pattern.permute.xlu1 %v257_v4 }
  0x2c   :  { %59 = vperm.xlu0 %165, %v38_v2   ;;  %89 = vperm.xlu1 %167, %v38_v2   ;;  %p231_p5 = por %p230_p4, %p229_p3 }
  0x2e   :  { %p232_p6 = pnand %p231_p5, %p225_p2 }
  0x30   :  { %168 = vset.pattern.permute.xlu1 %v258_v5  ;;  %169 = vset.pattern.permute.xlu0 %v258_v5 }
  0x31   :  { %104 = vperm.xlu1 %168, %v38_v2  }
  0xa6   :  { %v44_v11 = vpop.permute.xlu0 %43  ;;  %v75_v12 = vpop.permute.xlu1 %74 }
  0xa7   :  { %vm45_vm1 = vcmp.eq.s32.totalorder %v40_v7, %v44_v11  ;;  %vm46_vm2 = vcmp.eq.s32.totalorder %v41_v8, %v44_v11  ;;  %vm76_vm3 = vcmp.eq.s32.totalorder %v40_v7, %v75_v12  ;;  %vm77_vm4 = vcmp.eq.s32.totalorder %v41_v8, %v75_v12 }
  0xa8   :  { %v47_v13 = vsel %vm45_vm1, %v36_v9, 0.0  ;;  %v48_v14 = vsel %vm46_vm2, %v37_v10, 0.0  ;;  %v78_v15 = vsel %vm76_vm3, %v36_v9, 0.0  ;;  %v79_v16 = vsel %vm77_vm4, %v37_v10, 0.0 }
  0xa9   :  { %v50_v17 = vsel %vm49_vm0, %v47_v13, 0.0  ;;  %v51_v18 = vsel %vm49_vm0, %v48_v14, 0.0  ;;  %v80_v22 = vsel %vm49_vm0, %v78_v15, 0.0  ;;  %v81_v23 = vsel %vm49_vm0, %v79_v16, 0.0 }
  0xaa   :  { %v52_v19 = vadd.f32 %v51_v18, %v50_v17  ;;  %v82_v28 = vadd.f32 %v81_v23, %v80_v22 }
  0xab   :  { %v60_v20 = vpop.permute.xlu0 %59  ;;  %v90_v21 = vpop.permute.xlu1 %89 }
  0xac   :  { %vm61_vm5 = vcmp.eq.s32.totalorder %v40_v7, %v60_v20  ;;  %vm62_vm6 = vcmp.eq.s32.totalorder %v41_v8, %v60_v20  ;;  %vm91_vm7 = vcmp.eq.s32.totalorder %v40_v7, %v90_v21  ;;  %vm92_vm8 = vcmp.eq.s32.totalorder %v41_v8, %v90_v21  ;;  %53 = vadd.xlane.f32.xlu0 %v52_v19 }
  0xad   :  { %v63_v24 = vsel %vm61_vm5, %v36_v9, 0.0  ;;  %v64_v25 = vsel %vm62_vm6, %v37_v10, 0.0  ;;  %v93_v26 = vsel %vm91_vm7, %v36_v9, 0.0  ;;  %v94_v27 = vsel %vm92_vm8, %v37_v10, 0.0 }
  0xae   :  { %v65_v29 = vsel %vm49_vm0, %v63_v24, 0.0  ;;  %v66_v30 = vsel %vm49_vm0, %v64_v25, 0.0  ;;  %v95_v32 = vsel %vm49_vm0, %v93_v26, 0.0  ;;  %v96_v33 = vsel %vm49_vm0, %v94_v27, 0.0 }
  0xaf   :  { %v67_v31 = vadd.f32 %v66_v30, %v65_v29  ;;  %v97_v37 = vadd.f32 %v96_v33, %v95_v32 }
  0xb0   :  { %83 = vadd.xlane.f32.xlu0 %v82_v28  ;;  %v105_v34 = vpop.permute.xlu1 %104 }
  0xb1   :  { %vm106_vm9 = vcmp.eq.s32.totalorder %v40_v7, %v105_v34  ;;  %vm107_vm10 = vcmp.eq.s32.totalorder %v41_v8, %v105_v34  ;;  %68 = vadd.xlane.f32.xlu1 %v67_v31 }
  0xb2   :  { %v108_v35 = vsel %vm106_vm9, %v36_v9, 0.0  ;;  %v109_v36 = vsel %vm107_vm10, %v37_v10, 0.0 }
  0xb3   :  { %v110_v38 = vsel %vm49_vm0, %v108_v35, 0.0  ;;  %v111_v39 = vsel %vm49_vm0, %v109_v36, 0.0 }
  0xb4   :  { %98 = vadd.xlane.f32.xlu0 %v97_v37  ;;  %v112_v40 = vadd.f32 %v111_v39, %v110_v38 }
  0xb6   :  { %113 = vadd.xlane.f32.xlu1 %v112_v40 }
 0x139   :  { %v54_v41 = vpop.xlane.xlu0 %53 }
 0x13a   :  { %170 = vlog2.f32 %v54_v41 }
 0x13d   :  { %v84_v42 = vpop.xlane.xlu0 %83 }
 0x13e   :  { %172 = vlog2.f32 %v84_v42  ;;  %v69_v43 = vpop.xlane.xlu1 %68 }
 0x13f   :  { %174 = vlog2.f32 %v69_v43 }
 0x141   :  { %v99_v44 = vpop.xlane.xlu0 %98 }
 0x142   :  { %176 = vlog2.f32 %v99_v44 }
 0x143   :  { %v114_v45 = vpop.xlane.xlu1 %113 }
 0x144   :  { %v171_v46 = vpop.eup %170  ;;  %178 = vlog2.f32 %v114_v45 }
 0x145   :  { %v56_v47 = vmul.f32 0.6931472, %v171_v46 }
 0x147   :  { %v57_v50 = vsub.f32 0.0, %v56_v47 }
 0x148   :  { %v173_v48 = vpop.eup %172 }
 0x149   :  { %v175_v49 = vpop.eup %174  ;;  %v86_v53 = vmul.f32 0.6931472, %v173_v48 }
 0x14a   :  { %v71_v51 = vmul.f32 0.6931472, %v175_v49 }
 0x14c   :  { %v177_v52 = vpop.eup %176  ;;  %v72_v54 = vsub.f32 %v57_v50, %v71_v51 }
 0x14d   :  { %v101_v55 = vmul.f32 0.6931472, %v177_v52 }
 0x14e   :  { %v179_v57 = vpop.eup %178  ;;  %v87_v58 = vsub.f32 %v72_v54, %v86_v53 }
 0x14f   :  { %v116_v59 = vmul.f32 0.6931472, %v179_v57 }
 0x150   :  { %v102_v60 = vsub.f32 %v87_v58, %v101_v55 }
 0x152   :  { %v117_v61 = vsub.f32 %v102_v60, %v116_v59 }
 0x154   :  { %v124_v62 = vsel %vm123_vm11, %v117_v61, 0.0 }
 0x155   :  { %v126_v63 = vsel %vm125_vm12, %v124_v62, 0.0 }
 0x156   :  { %127 = vadd.xlane.f32.xlu0 %v126_v63 }
 0x1e3   :  { %v128_v0 = vpop.xlane.xlu0 %127 }
 0x1e4   :  { %v129_v1 = vrot.slane %v128_v0, 4 }
 0x1e6   :  { %v130_v2 = vadd.f32 %v129_v1, %v128_v0 }
 0x1e8   :  { %v131_v3 = vrot.slane %v130_v2, 2 }
 0x1ea   :  { %v132_v4 = vadd.f32 %v131_v3, %v130_v2 }
 0x1ec   :  { %v133_v5 = vrot.slane %v132_v4, 1 }
 0x1ee   :  { %v134_v7 = vadd.f32 %v133_v5, %v132_v4 }
 0x1f0   :  { %154 = vpush %v134_v7 }
 0x221   :  { %s155_s5 = spop %154 }
 0x222   :  { %v136_v6 = vstv %s155_s5 }
 0x223   :  { %137 = vst [vmem:[#allocation7] sm:$0xff] %v136_v6 }
 0x224   :  { %235 = shalt.err (!%p232_p6)
}
 0x225   :  { %s236_s9 = scalar_lea.hbm %s325_s2, 128 }
 0x226   :  { %p237_p7 = scmp.ne.s32.totalorder %s325_s2, %s236_s9  ;;  %p240_p8 = scmp.lt.u32.totalorder %s236_s9, %s325_s2 }
 0x228   :  { %p242_p9 = pnand %p240_p8, %p237_p7 }
 0x22a   :  { %245 = shalt.err (!%p242_p9)
}
 0x22b   :  { %147 = dma.vmem_to_hbm [thread:$0]  %s145_s4, 128, %s325_s2, [#allocation4]  }
 0x22c   :  { %250 = dma.done.wait [#allocation4], 128  }
 0x22d   :  { %251 = vsyncadd [#allocation4], 4294967168 }
 0x22e   :  { %151 = vsyncpa [#allocation3], 1 }
 0x22f   :  { %152 = vsyncpa [#allocation6], 1 }
 0x230   :  { %153 = vsyncpa [#allocation4], 1 }

</bundles_post_ra>
